<compile_context>
chip_gen: v5e
topology: v5e:2x2
jax: 0.10.0
libtpu: 0.0.40
codegen_flags: <defaults>
</compile_context>

<pallas_src>
import functools

import jax
import jax.numpy as jnp
from jax.experimental import pallas as pl
from jax.experimental.pallas import tpu as pltpu

_LANES = 128
_SUBLANES = 8
_CHUNK = _SUBLANES * _LANES          # 1024 elems = one full f32 (8,128) tile
_MAX_TILE_ROWS = 8192                # (8192, 128) f32 block = 4 MiB
_MIN_GRID_STEPS = 4                  # keep both v7x TensorCores fed
_VMEM_LIMIT_BYTES = 32 * 1024 * 1024 # 24 MiB double-buffered + headroom;
                                     # raises v5e's 16 MiB scoped default,
                                     # fits v6e/v7x defaults & physical VMEM


def _hswish_add_kernel(x_ref, y_ref, o_ref):
    """o = y + x * relu6(x + 3) / 6   (fused elementwise, VPU)."""
    x = x_ref[...]
    y = y_ref[...]
    relu6 = jnp.clip(x + 3.0, 0.0, 6.0)
    o_ref[...] = y + x * relu6 * (1.0 / 6.0)


def _pick_tile_rows(rows):
    """Block rows: multiple of 8, <= rows, <= 8192, aiming for >= 4 grid steps."""
    if rows <= _SUBLANES:
        return rows  # single block equal to the full (tiny) array
    tile = pl.cdiv(rows, _MIN_GRID_STEPS)
    tile = ((tile + _SUBLANES - 1) // _SUBLANES) * _SUBLANES
    tile = min(tile, _MAX_TILE_ROWS)
    return min(tile, (rows // _SUBLANES) * _SUBLANES)


def _run_2d(x2d, y2d, allow_input_fusion=None):
    rows, lanes = x2d.shape
    tile_r = _pick_tile_rows(rows)
    grid = (pl.cdiv(rows, tile_r),)
    return pl.pallas_call(
        _hswish_add_kernel,
        out_shape=jax.ShapeDtypeStruct((rows, lanes), x2d.dtype),
        grid=grid,
        in_specs=[
            pl.BlockSpec((tile_r, lanes), lambda i: (i, 0)),
            pl.BlockSpec((tile_r, lanes), lambda i: (i, 0)),
        ],
        out_specs=pl.BlockSpec((tile_r, lanes), lambda i: (i, 0)),
        compiler_params=pltpu.CompilerParams(
            dimension_semantics=("parallel",),
            vmem_limit_bytes=_VMEM_LIMIT_BYTES,
            allow_input_fusion=allow_input_fusion,
        ),
    )(x2d, y2d)


@jax.jit
def foo_model_forward(input1, input2, bias=None):
    """JAX/Pallas equivalent of FooModel.forward.

    input1, input2: float32 arrays of identical shape (e.g. NCHW).
    bias: unused in forward (kept for parity with the PyTorch module).
    """
    del bias  # not used by HSwishImplementation.forward
    assert input1.shape == input2.shape
    assert input1.dtype == input2.dtype
    orig_shape = input1.shape
    dtype = input1.dtype
    total = input1.size

    if total % _LANES == 0:
        # Fast path: contiguous reshape to (rows, 128) is free (no pad, no
        # output slice).  Partial last grid block (rows % tile_r != 0) is
        # handled by Pallas with a masked store — safe for elementwise ops.
        rows = total // _LANES
        x2d = input1.reshape(rows, _LANES)
        y2d = input2.reshape(rows, _LANES)
        out2d = _run_2d(x2d, y2d)
        return out2d.reshape(orig_shape)

    # Ragged fallback: pad the flattened element count up to a multiple of
    # 8*128 so every block is a well-formed (8,128)-tiled layout.  Under jit,
    # allow_input_fusion lets XLA fuse the pad/reshape into the pallas_call
    # operands instead of materializing padded HBM copies.
    # TODO(synk): replace pad with an in-kernel masked tail via
    # PrefetchScalarGridSpec if ragged sizes ever become the hot path.
    padded_total = ((total + _CHUNK - 1) // _CHUNK) * _CHUNK
    pad = padded_total - total
    rows = padded_total // _LANES

    x2d = jnp.pad(input1.reshape(-1), (0, pad)).reshape(rows, _LANES)
    y2d = jnp.pad(input2.reshape(-1), (0, pad)).reshape(rows, _LANES)
    out2d = _run_2d(x2d, y2d, allow_input_fusion=[True, True])
    return out2d.reshape(-1)[:total].reshape(orig_shape).astype(dtype)


if __name__ == "__main__":
    # Deterministic parameter init, mirroring MemoryEfficientHSwish.__init__:
    # bias = zeros((5,3,3,1)).fill_(3.15)  (unused in forward)
    bias = jnp.full((5, 3, 3, 1), 3.15, dtype=jnp.float32)

    key = jax.random.PRNGKey(0)
    k1, k2 = jax.random.split(key)
    shape = (2, 4, 16, 16)  # NCHW: batch=2, channels=4, spatial=16
    input1 = jax.random.normal(k1, shape, dtype=jnp.float32)
    input2 = jax.random.normal(k2, shape, dtype=jnp.float32)

    out = foo_model_forward(input1, input2, bias)
    out = jax.block_until_ready(out)

    # Reference check in plain JAX.
    ref = input2 + input1 * jnp.clip(input1 + 3.0, 0.0, 6.0) / 6.0
    assert out.shape == shape and out.dtype == jnp.float32
    assert jnp.allclose(out, ref, atol=1e-6, rtol=1e-6)

    # Also exercise the ragged (non-128-divisible) fallback path.
    odd_shape = (3, 5, 7, 11)
    a = jax.random.normal(k1, odd_shape, dtype=jnp.float32)
    b = jax.random.normal(k2, odd_shape, dtype=jnp.float32)
    out_odd = jax.block_until_ready(foo_model_forward(a, b, bias))
    ref_odd = b + a * jnp.clip(a + 3.0, 0.0, 6.0) / 6.0
    assert jnp.allclose(out_odd, ref_odd, atol=1e-6, rtol=1e-6)

    # And a larger 128-divisible case that exercises multi-step tiling.
    big_shape = (8, 32, 32, 32)  # 262144 elems -> rows=2048, grid=4
    c = jax.random.normal(k1, big_shape, dtype=jnp.float32)
    d = jax.random.normal(k2, big_shape, dtype=jnp.float32)
    out_big = jax.block_until_ready(foo_model_forward(c, d, bias))
    ref_big = d + c * jnp.clip(c + 3.0, 0.0, 6.0) / 6.0
    assert jnp.allclose(out_big, ref_big, atol=1e-6, rtol=1e-6)

    print("KERNEL_OK")
</pallas_src>

<mosaic_0001>
module attributes {stable_mosaic.version = 11 : i64} {
  func.func @_hswish_add_kernel(%arg0: i32, %arg1: memref<8x128xf32, #tpu.memory_space<vmem>>, %arg2: memref<8x128xf32, #tpu.memory_space<vmem>>, %arg3: memref<8x128xf32, #tpu.memory_space<vmem>>) attributes {dimension_semantics = [#tpu.dimension_semantics<parallel>], iteration_bounds = array<i64: 2>, scalar_prefetch = 0 : i64, scratch_operands = 0 : i64, tpu.core_type = #tpu.core_type<tc>, window_params = [{transform_indices = @transform_0, window_bounds = array<i64: 8, 128>}, {transform_indices = @transform_1, window_bounds = array<i64: 8, 128>}, {transform_indices = @transform_2, window_bounds = array<i64: 8, 128>}]} {
    %c0 = arith.constant 0 : index
    %c0_0 = arith.constant 0 : index
    %0 = vector.load %arg1[%c0, %c0_0] : memref<8x128xf32, #tpu.memory_space<vmem>>, vector<8x128xf32>
    %c0_1 = arith.constant 0 : index
    %c0_2 = arith.constant 0 : index
    %1 = vector.load %arg2[%c0_1, %c0_2] : memref<8x128xf32, #tpu.memory_space<vmem>>, vector<8x128xf32>
    %cst = arith.constant 3.000000e+00 : f32
    %2 = vector.broadcast %cst : f32 to vector<8x128xf32>
    %3 = arith.addf %0, %2 : vector<8x128xf32>
    %cst_3 = arith.constant 0.000000e+00 : f32
    %cst_4 = arith.constant 6.000000e+00 : f32
    %4 = vector.broadcast %cst_3 : f32 to vector<8x128xf32>
    %5 = arith.maximumf %4, %3 : vector<8x128xf32>
    %6 = vector.broadcast %cst_4 : f32 to vector<8x128xf32>
    %7 = arith.minimumf %6, %5 : vector<8x128xf32>
    %8 = arith.mulf %0, %7 : vector<8x128xf32>
    %cst_5 = arith.constant 0.166666672 : f32
    %9 = vector.broadcast %cst_5 : f32 to vector<8x128xf32>
    %10 = arith.mulf %8, %9 : vector<8x128xf32>
    %11 = arith.addf %1, %10 : vector<8x128xf32>
    %c0_6 = arith.constant 0 : index
    %c0_7 = arith.constant 0 : index
    %12 = vector.load %arg3[%c0_6, %c0_7] : memref<8x128xf32, #tpu.memory_space<vmem>>, vector<8x128xf32>
    tpu.vector_store %arg3[%c0_6, %c0_7], %11 {strides = array<i32>} : memref<8x128xf32, #tpu.memory_space<vmem>>, vector<8x128xf32>,
    return
  }
  func.func @transform_0(%arg0: i32) -> (i32, i32) {
    %c0_i32 = arith.constant 0 : i32
    %c0_i32_0 = arith.constant 0 : i32
    return %arg0, %c0_i32 : i32, i32
  }
  func.func @transform_1(%arg0: i32) -> (i32, i32) {
    %c0_i32 = arith.constant 0 : i32
    %c0_i32_0 = arith.constant 0 : i32
    return %arg0, %c0_i32 : i32, i32
  }
  func.func @transform_2(%arg0: i32) -> (i32, i32) {
    %c0_i32 = arith.constant 0 : i32
    %c0_i32_0 = arith.constant 0 : i32
    return %arg0, %c0_i32 : i32, i32
  }
}

</mosaic_0001>

<bundles_post_ra>
// kernel: foo_model_forward.1
= control target key start
LH: loop header
LB: loop body
LE: loop exit
PB: predicated region body
PF: predicated region fallthrough
CT: control target
= control target key end

     0   :  { %s252_s9 = smov 0   ;;  %s280_s0 = inlined_call_operand.vmem [shape: f32[16,128], index: 0, kind: input, shape index: {}]   ;;  %s281_s1 = inlined_call_operand.vmem [shape: f32[16,128], index: 1, kind: input, shape index: {}]   ;;  %s282_s2 = inlined_call_operand.vmem [shape: f32[16,128], index: 2, kind: output, shape index: {}]  }
   0x1 LB: > { %s230_s10 = sadd.s32 4294967295, %s254_s9   ;;  %p234_p0 = scmp.ge.s32.totalorder %s254_s9, 1  ;;  %s254_s9 = sphi %s252_s9, %s12_s9  }
   0x2   : > { %p120_p1 = scmp.lt.s32.totalorder %s254_s9, 3 }
   0x4   : > { %p121_p2 = pnand %p234_p0, %p120_p1 }
   0x5   : > { %p144_p3 = scmp.lt.s32.totalorder (!%p121_p2), %s230_s10, 1 }
   0x6   : > { %124 = sbr.rel (%p121_p2) target bundleno = 28 (0x1c), region = 28 }
   0xb   : > { %s284_s10 = smov (!%p144_p3, %s230_s10), 1 }
   0xc   : > { %s235_s11 = sshll.u32 %s284_s10, 3 }
   0xd   : > { %s147_s14 = scalar_lea.vmem %s280_s0, %s235_s11  ;;  %s151_s17 = scalar_lea.vmem %s281_s1, %s235_s11 }
   0xe   : > { %v156_v0 = vld [vmem:[%s147_s14] sm:$0xff]  ;;  %s155_s20 = scalar_lea.vmem %s282_s2, %s235_s11 }
   0xf   : > { %v158_v1 = vadd.f32 3.0, %v156_v0  ;;  %v157_v5 = vld [vmem:[%s151_s17] sm:$0xff] }
  0x11   : > { %v159_v2 = vmax.f32 %v158_v1, 0.0 }
  0x13   : > { %v160_v3 = vmin.f32 %v159_v2, 6.0 }
  0x15   : > { %v161_v4 = vmul.f32 %v160_v3, %v156_v0 }
  0x17   : > { %v162_v6 = vmul.f32 0.16666667, %v161_v4 }
  0x19   : > { %v163_v7 = vadd.f32 %v162_v6, %v157_v5 }
  0x1b   : > { %164 = vst [vmem:[%s155_s20] sm:$0xff] %v163_v7 }
  0x1c PF: > { %s12_s9 = sadd.s32 1, %s254_s9  }
  0x1d   : > { %p9_p4 = scmp.ge.s32.totalorder %s12_s9, 4  }
  0x1f   :  { %11 = sbr.rel (!%p9_p4) target bundleno = 1 (0x1), region = 61 }

</bundles_post_ra>
